<compile_context>
chip_gen: v7x
topology: tpu7x:2x2x1
jax: 0.10.0
libtpu: 0.0.40
codegen_flags: <defaults>
</compile_context>

<pallas_src>
import jax
import jax.numpy as jnp
from jax.experimental import pallas as pl
from jax.experimental.pallas import tpu as pltpu

LANE = 128


def _round_up(n, m):
    return ((n + m - 1) // m) * m


def _mlp_kernel(x_ref, w1_ref, b1_ref, w2_ref, b2_ref, w3_ref, b3_ref, out_ref):
    """Fused fc1 -> relu -> fc2 -> relu -> fc3 for one batch tile.

    Matmuls run on the MXU with f32 accumulation; bias-add / ReLU stay in f32
    on the VPU.  x is cast to the weight dtype (bf16) in-kernel so it is read
    from HBM exactly once as f32.  Zero-padded hidden columns stay exactly
    zero through ReLU, so the padded lanes never perturb the result.
    """
    cd = w1_ref.dtype
    x = x_ref[...].astype(cd)
    h1 = jnp.dot(x, w1_ref[...], preferred_element_type=jnp.float32)
    h1 = jnp.maximum(h1 + b1_ref[...], 0.0)
    h2 = jnp.dot(h1.astype(cd), w2_ref[...], preferred_element_type=jnp.float32)
    h2 = jnp.maximum(h2 + b2_ref[...], 0.0)
    out = jnp.dot(h2.astype(cd), w3_ref[...], preferred_element_type=jnp.float32)
    out_ref[...] = (out + b3_ref[...]).astype(out_ref.dtype)


def supervised_regression_forward(x, params, *, block_batch=4096):
    """x: [B, input_size] float32.  params: dict from init_params (weights
    pre-transposed to [in, out] and pre-cast to bf16; hidden dims padded to
    multiples of 128, output columns left at the true out_size)."""
    w1, b1 = params["w1"], params["b1"]
    w2, b2 = params["w2"], params["b2"]
    w3, b3 = params["w3"], params["b3"]

    B, K = x.shape
    out_size = w3.shape[1]

    # Batch tile: multiple of the f32 sublane granularity (8), capped both by
    # block_batch and by ~B/2 so the batch grid keeps >=2 steps when B allows
    # (both v7x TensorCores get work).  Ragged last tile handled by pl.cdiv.
    half_b = max(8, _round_up(-(-B // 2), 8))
    tb = max(8, (min(int(block_batch), half_b) // 8) * 8)
    grid_b = pl.cdiv(B, tb)

    # Weights / biases stay resident in VMEM across all batch tiles
    # (index_map is constant -> no re-DMA).
    def resident(a):
        return pl.BlockSpec(a.shape, lambda i: (0,) * a.ndim)

    out = pl.pallas_call(
        _mlp_kernel,
        out_shape=jax.ShapeDtypeStruct((B, out_size), jnp.float32),
        grid=(grid_b,),
        in_specs=[
            pl.BlockSpec((tb, K), lambda i: (i, 0)),
            resident(w1), resident(b1),
            resident(w2), resident(b2),
            resident(w3), resident(b3),
        ],
        out_specs=pl.BlockSpec((tb, out_size), lambda i: (i, 0)),
        compiler_params=pltpu.CompilerParams(
            dimension_semantics=("parallel",),
        ),
    )(x, w1, b1, w2, b2, w3, b3)

    return out


def init_params(key, input_size, output_size, compute_dtype=jnp.bfloat16):
    """Mimics torch.nn.Linear default init on the true shapes.  Weights are
    stored transposed ([in, out]) and pre-cast to compute_dtype; hidden dims
    are zero-padded to multiples of 128 (ReLU(0)=0 keeps math identical).
    The final layer keeps its true out_size columns so the kernel stores a
    narrow output.  Biases stay f32 with shape [1, cols]."""
    h1, h2 = 100, 50
    h1p, h2p = _round_up(h1, LANE), _round_up(h2, LANE)

    def linear_init(k, fan_in, fan_out, rows_pad, cols_pad):
        kw, kb = jax.random.split(k)
        bound = 1.0 / (fan_in ** 0.5)
        w = jax.random.uniform(kw, (fan_in, fan_out), jnp.float32,
                               minval=-bound, maxval=bound)
        b = jax.random.uniform(kb, (1, fan_out), jnp.float32,
                               minval=-bound, maxval=bound)
        w = jnp.pad(w, ((0, rows_pad - fan_in), (0, cols_pad - fan_out)))
        b = jnp.pad(b, ((0, 0), (0, cols_pad - fan_out)))
        return w.astype(compute_dtype), b

    k1, k2, k3 = jax.random.split(key, 3)
    w1, b1 = linear_init(k1, input_size, h1, input_size, h1p)
    w2, b2 = linear_init(k2, h1, h2, h1p, h2p)
    w3, b3 = linear_init(k3, h2, output_size, h2p, output_size)
    return {"w1": w1, "b1": b1, "w2": w2, "b2": b2, "w3": w3, "b3": b3}


def reference_forward(x, params):
    """Pure-JAX reference with the same bf16-input / f32-accumulate recipe."""
    cd = params["w1"].dtype
    h1 = jnp.dot(x.astype(cd), params["w1"],
                 preferred_element_type=jnp.float32) + params["b1"]
    h1 = jnp.maximum(h1, 0.0)
    h2 = jnp.dot(h1.astype(cd), params["w2"],
                 preferred_element_type=jnp.float32) + params["b2"]
    h2 = jnp.maximum(h2, 0.0)
    out = jnp.dot(h2.astype(cd), params["w3"],
                  preferred_element_type=jnp.float32) + params["b3"]
    return out


if __name__ == "__main__":
    key = jax.random.PRNGKey(0)
    k_x, k_p = jax.random.split(key)

    batch = 8
    input_size = 32
    output_size = 4

    x = jax.random.normal(k_x, (batch, input_size), jnp.float32)
    params = init_params(k_p, input_size, output_size)

    out = supervised_regression_forward(x, params)
    out = jax.block_until_ready(out)

    ref = reference_forward(x, params)
    assert out.shape == (batch, output_size)
    assert jnp.allclose(out, ref, atol=2e-3, rtol=2e-3), (
        "mismatch vs reference: max abs diff "
        f"{float(jnp.max(jnp.abs(out - ref)))}")

    print("KERNEL_OK")
</pallas_src>

<mosaic_0001>
module attributes {stable_mosaic.version = 11 : i64} {
  func.func @_mlp_kernel(%arg0: i32, %arg1: memref<8x32xf32, #tpu.memory_space<vmem>>, %arg2: memref<32x128xbf16, #tpu.memory_space<vmem>>, %arg3: memref<1x128xf32, #tpu.memory_space<vmem>>, %arg4: memref<128x128xbf16, #tpu.memory_space<vmem>>, %arg5: memref<1x128xf32, #tpu.memory_space<vmem>>, %arg6: memref<128x4xbf16, #tpu.memory_space<vmem>>, %arg7: memref<1x4xf32, #tpu.memory_space<vmem>>, %arg8: memref<8x4xf32, #tpu.memory_space<vmem>>) attributes {dimension_semantics = [#tpu.dimension_semantics<parallel>], iteration_bounds = array<i64: 1>, scalar_prefetch = 0 : i64, scratch_operands = 0 : i64, tpu.core_type = #tpu.core_type<tc>, window_params = [{transform_indices = @transform_0, window_bounds = array<i64: 8, 32>}, {pipeline_mode = #tpu.pipeline_mode<synchronous>, transform_indices = @transform_1, window_bounds = array<i64: 32, 128>}, {pipeline_mode = #tpu.pipeline_mode<synchronous>, transform_indices = @transform_2, window_bounds = array<i64: 1, 128>}, {pipeline_mode = #tpu.pipeline_mode<synchronous>, transform_indices = @transform_3, window_bounds = array<i64: 128, 128>}, {pipeline_mode = #tpu.pipeline_mode<synchronous>, transform_indices = @transform_4, window_bounds = array<i64: 1, 128>}, {pipeline_mode = #tpu.pipeline_mode<synchronous>, transform_indices = @transform_5, window_bounds = array<i64: 128, 4>}, {pipeline_mode = #tpu.pipeline_mode<synchronous>, transform_indices = @transform_6, window_bounds = array<i64: 1, 4>}, {transform_indices = @transform_7, window_bounds = array<i64: 8, 4>}]} {
    %c0 = arith.constant 0 : index
    %c0_0 = arith.constant 0 : index
    %0 = vector.load %arg1[%c0, %c0_0] : memref<8x32xf32, #tpu.memory_space<vmem>>, vector<8x32xf32>
    %1 = arith.truncf %0 : vector<8x32xf32> to vector<8x32xbf16>
    %c0_1 = arith.constant 0 : index
    %c0_2 = arith.constant 0 : index
    %2 = vector.load %arg2[%c0_1, %c0_2] : memref<32x128xbf16, #tpu.memory_space<vmem>>, vector<32x128xbf16>
    %cst = arith.constant dense<0.000000e+00> : vector<8x128xf32>
    %3 = tpu.matmul %1, %2, %cst {dimension_numbers = #tpu.dot_dimension_numbers<[1], [0], [0], [1], [0, 0, 1, 1], [], []>} : vector<8x32xbf16>, vector<32x128xbf16>, vector<8x128xf32> -> vector<8x128xf32>
    %c0_3 = arith.constant 0 : index
    %c0_4 = arith.constant 0 : index
    %4 = vector.load %arg3[%c0_3, %c0_4] : memref<1x128xf32, #tpu.memory_space<vmem>>, vector<1x128xf32>
    %5 = vector.broadcast %4 : vector<1x128xf32> to vector<8x128xf32>
    %6 = arith.addf %3, %5 : vector<8x128xf32>
    %cst_5 = arith.constant 0.000000e+00 : f32
    %7 = vector.broadcast %cst_5 : f32 to vector<8x128xf32>
    %8 = arith.maximumf %6, %7 : vector<8x128xf32>
    %9 = arith.truncf %8 : vector<8x128xf32> to vector<8x128xbf16>
    %c0_6 = arith.constant 0 : index
    %c0_7 = arith.constant 0 : index
    %10 = vector.load %arg4[%c0_6, %c0_7] : memref<128x128xbf16, #tpu.memory_space<vmem>>, vector<128x128xbf16>
    %cst_8 = arith.constant dense<0.000000e+00> : vector<8x128xf32>
    %11 = tpu.matmul %9, %10, %cst_8 {dimension_numbers = #tpu.dot_dimension_numbers<[1], [0], [0], [1], [0, 0, 1, 1], [], []>} : vector<8x128xbf16>, vector<128x128xbf16>, vector<8x128xf32> -> vector<8x128xf32>
    %c0_9 = arith.constant 0 : index
    %c0_10 = arith.constant 0 : index
    %12 = vector.load %arg5[%c0_9, %c0_10] : memref<1x128xf32, #tpu.memory_space<vmem>>, vector<1x128xf32>
    %13 = vector.broadcast %12 : vector<1x128xf32> to vector<8x128xf32>
    %14 = arith.addf %11, %13 : vector<8x128xf32>
    %cst_11 = arith.constant 0.000000e+00 : f32
    %15 = vector.broadcast %cst_11 : f32 to vector<8x128xf32>
    %16 = arith.maximumf %14, %15 : vector<8x128xf32>
    %17 = arith.truncf %16 : vector<8x128xf32> to vector<8x128xbf16>
    %c0_12 = arith.constant 0 : index
    %c0_13 = arith.constant 0 : index
    %18 = vector.load %arg6[%c0_12, %c0_13] : memref<128x4xbf16, #tpu.memory_space<vmem>>, vector<128x4xbf16>
    %cst_14 = arith.constant dense<0.000000e+00> : vector<8x4xf32>
    %19 = tpu.matmul %17, %18, %cst_14 {dimension_numbers = #tpu.dot_dimension_numbers<[1], [0], [0], [1], [0, 0, 1, 1], [], []>} : vector<8x128xbf16>, vector<128x4xbf16>, vector<8x4xf32> -> vector<8x4xf32>
    %c0_15 = arith.constant 0 : index
    %c0_16 = arith.constant 0 : index
    %20 = vector.load %arg7[%c0_15, %c0_16] : memref<1x4xf32, #tpu.memory_space<vmem>>, vector<1x4xf32>
    %21 = vector.broadcast %20 : vector<1x4xf32> to vector<8x4xf32>
    %22 = arith.addf %19, %21 : vector<8x4xf32>
    %c0_17 = arith.constant 0 : index
    %c0_18 = arith.constant 0 : index
    %23 = vector.load %arg8[%c0_17, %c0_18] : memref<8x4xf32, #tpu.memory_space<vmem>>, vector<8x4xf32>
    tpu.vector_store %arg8[%c0_17, %c0_18], %22 {strides = array<i32>} : memref<8x4xf32, #tpu.memory_space<vmem>>, vector<8x4xf32>,
    return
  }
  func.func @transform_0(%arg0: i32) -> (i32, i32) {
    %c0_i32 = arith.constant 0 : i32
    %c0_i32_0 = arith.constant 0 : i32
    return %arg0, %c0_i32 : i32, i32
  }
  func.func @transform_1(%arg0: i32) -> (i32, i32) {
    %c0_i32 = arith.constant 0 : i32
    %c0_i32_0 = arith.constant 0 : i32
    %c0_i32_1 = arith.constant 0 : i32
    return %c0_i32, %c0_i32_0 : i32, i32
  }
  func.func @transform_2(%arg0: i32) -> (i32, i32) {
    %c0_i32 = arith.constant 0 : i32
    %c0_i32_0 = arith.constant 0 : i32
    %c0_i32_1 = arith.constant 0 : i32
    return %c0_i32, %c0_i32_0 : i32, i32
  }
  func.func @transform_3(%arg0: i32) -> (i32, i32) {
    %c0_i32 = arith.constant 0 : i32
    %c0_i32_0 = arith.constant 0 : i32
    %c0_i32_1 = arith.constant 0 : i32
    return %c0_i32, %c0_i32_0 : i32, i32
  }
  func.func @transform_4(%arg0: i32) -> (i32, i32) {
    %c0_i32 = arith.constant 0 : i32
    %c0_i32_0 = arith.constant 0 : i32
    %c0_i32_1 = arith.constant 0 : i32
    return %c0_i32, %c0_i32_0 : i32, i32
  }
  func.func @transform_5(%arg0: i32) -> (i32, i32) {
    %c0_i32 = arith.constant 0 : i32
    %c0_i32_0 = arith.constant 0 : i32
    %c0_i32_1 = arith.constant 0 : i32
    return %c0_i32, %c0_i32_0 : i32, i32
  }
  func.func @transform_6(%arg0: i32) -> (i32, i32) {
    %c0_i32 = arith.constant 0 : i32
    %c0_i32_0 = arith.constant 0 : i32
    %c0_i32_1 = arith.constant 0 : i32
    return %c0_i32, %c0_i32_0 : i32, i32
  }
  func.func @transform_7(%arg0: i32) -> (i32, i32) {
    %c0_i32 = arith.constant 0 : i32
    %c0_i32_0 = arith.constant 0 : i32
    return %arg0, %c0_i32 : i32, i32
  }
}

</mosaic_0001>

<bundles_post_ra>
// kernel: tpu_custom_call.1
= control target key start
LH: loop header
LB: loop body
LE: loop exit
PB: predicated region body
PF: predicated region fallthrough
CT: control target
= control target key end

     0   :  { %12 = vsyncpa [#allocation3], 0  ;;  %s481_s24 = smov [#allocation2]   ;;  %s625_s0 = inlined_call_operand.vmem [shape: f32[8,32], index: 0, kind: input, shape index: {}]   ;;  %s626_s1 = inlined_call_operand.hbm [shape: bf16[32,128], index: 1, kind: input, shape index: {}]   ;;  %s627_s2 = inlined_call_operand.vmem [shape: f32[1,128], index: 2, kind: input, shape index: {}]   ;;  %s628_s3 = inlined_call_operand.vmem [shape: bf16[128,128], index: 3, kind: input, shape index: {}]   ;;  %s629_s4 = inlined_call_operand.vmem [shape: f32[1,128], index: 4, kind: input, shape index: {}]   ;;  %s630_s5 = inlined_call_operand.vmem [shape: bf16[128,4], index: 5, kind: input, shape index: {}]   ;;  %s631_s6 = inlined_call_operand.vmem [shape: f32[1,4], index: 6, kind: input, shape index: {}]   ;;  %s632_s7 = inlined_call_operand.vmem [shape: f32[8,4], index: 7, kind: output, shape index: {}]  }
   0x1   :  { %s20_s25 = sshll.u32 %s481_s24, 4  ;;  %s457_s28 = scalar_lea.hbm %s626_s1, 256  ;;  %s21_s25 = int_to_ptr.vmem [resolvable:$true] %s20_s25 }
   0x2   :  { %p458_p0 = scmp.ne.s32.totalorder %s626_s1, %s457_s28  ;;  %p461_p1 = scmp.lt.u32.totalorder %s457_s28, %s626_s1 }
   0x4   :  { %p463_p2 = pnand %p461_p1, %p458_p0 }
   0x6   :  { %466 = shalt.err (!%p463_p2)
}
   0x7   :  { %s467_s10 = scalar_lea.vmem %s21_s25, 256  ;;  %p472_p4 = scmp.lt.s32.totalorder %s21_s25, %s21_s25 }
   0x8   :  { %p468_p3 = scmp.ne.s32.totalorder %s21_s25, %s467_s10  ;;  %p473_p5 = scmp.lt.s32.totalorder %s467_s10, %s467_s10 }
   0xa   :  { %p474_p6 = por %p473_p5, %p472_p4 }
   0xc   :  { %p475_p7 = pnand %p474_p6, %p468_p3 }
   0xe   :  { %478 = shalt.err (!%p475_p7)
}
   0xf   :  { %s482_s11 = smov 64   ;;  %s483_s12 = smov 4  }
  0x10   :  { %26 = dma.hbm_to_vmem [thread:$0]  %s626_s1, 256, %s21_s25, [#allocation3], %s482_s11, %s482_s11, %s483_s12  }
  0x11   :  { %479 = dma.done.wait [#allocation3], 256  }
  0x12   :  { %480 = vsyncadd [#allocation3], 4294967040  ;;  %v484_v0 = vmov 0.0   ;;  %vm485_vm0 = vmmov 0   ;;  %v439_v1 = vld [vmem:[#allocation2] sm:$0xff]   ;;  %v440_v2 = vld [vmem:[#allocation2 + $0x8] sm:$0xff]  }
  0x13   :  { %386 = vmatprep.subr.bf16.mxu0 %v484_v0  ;;  %390 = vmatprep.mubr.msk.bf16.mxu0 %vm485_vm0, %v484_v0  ;;  %v41_v3 = vld [vmem:[%s625_s0] sm:$0xff]  ;;  %v442_v6 = vld [vmem:[%s628_s3 + $0x8] sm:$0xff]   ;;  %vm66_vm1 = vcmask 261120   ;;  %v443_v7 = vld [vmem:[%s628_s3 + $0x10] sm:$0xff]   ;;  %vm336_vm2 = vcmask 31744  }
  0x14   :  { %394 = vmatprep.subr.bf16.mxu1 %v484_v0  ;;  %410 = vmatprep.mubr.msk.bf16.mxu1 %vm485_vm0, %v484_v0  ;;  %v441_v4 = vld [vmem:[%s628_s3] sm:$0xff]   ;;  %v42_v5 = vpack.c.bf16 %v41_v3, %v41_v3  ;;  %v444_v8 = vld [vmem:[%s628_s3 + $0x18] sm:$0xff]   ;;  %v446_v10 = vld [vmem:[%s628_s3 + $0x28] sm:$0xff]  }
  0x15   :  { %387 = vmatpush3.bf16.msra.mxu0 %v439_v1  ;;  %395 = vmatpush3.bf16.msra.mxu1 %v441_v4  ;;  %v445_v9 = vld [vmem:[%s628_s3 + $0x20] sm:$0xff]   ;;  %v447_v11 = vld [vmem:[%s628_s3 + $0x30] sm:$0xff]   ;;  %v448_v12 = vld [vmem:[%s628_s3 + $0x38] sm:$0xff]  }
  0x16   :  { %388 = vmatprep.subr.bf16.mxu0 %v484_v0  ;;  %396 = vmatprep.subr.bf16.mxu1 %v484_v0  ;;  %v449_v13 = vld [vmem:[%s630_s5] sm:$0xff]   ;;  %v450_v14 = vld [vmem:[%s630_s5 + $0x8] sm:$0xff]   ;;  %v451_v15 = vld [vmem:[%s630_s5 + $0x10] sm:$0xff]  }
  0x17   :  { %v452_v16 = vld [vmem:[%s630_s5 + $0x18] sm:$0xff]   ;;  %v453_v17 = vld [vmem:[%s630_s5 + $0x20] sm:$0xff]   ;;  %v454_v18 = vld [vmem:[%s630_s5 + $0x28] sm:$0xff]  }
  0x18   :  { %v343_v19 = vld [vmem:[%s627_s2] ss:$0 sm:$0xff]  ;;  %v455_v27 = vld [vmem:[%s630_s5 + $0x30] sm:$0xff]   ;;  %v456_v28 = vld [vmem:[%s630_s5 + $0x38] sm:$0xff]  }
  0x19   :  { %389 = vmatpush3.bf16.msra.mxu0 %v440_v2  ;;  %397 = vmatpush3.bf16.msra.mxu1 %v442_v6  ;;  %v347_v29 = vld [vmem:[%s629_s4] ss:$0 sm:$0xff] }
  0x1a   :  { %414 = vmatprep.subr.bf16.mxu0 %v484_v0  ;;  %398 = vmatprep.subr.bf16.mxu1 %v484_v0  ;;  %v356_v37 = vld [vmem:[%s631_s6] ss:$0 sm:$0xff] }
  0x1c   :  { %391 = vmatmul.mubr.msk.bf16.vlgmr.msra.gmra.mrb[0].mxu0 %vm66_vm1, %v42_v5 }
  0x1d   :  { %430 = vmatprep.mubr.msk.bf16.mxu0 %vm485_vm0, %v484_v0  ;;  %399 = vmatpush3.bf16.msra.mxu1 %v443_v7 }
  0x1e   :  { %400 = vmatprep.subr.bf16.mxu1 %v484_v0  ;;  %415 = vmatpush3.bf16.msra.mxu0 %v449_v13 }
  0x1f   :  { %416 = vmatprep.subr.bf16.mxu0 %v484_v0 }
  0x21   :  { %401 = vmatpush3.bf16.msra.mxu1 %v444_v8 }
  0x22   :  { %402 = vmatprep.subr.bf16.mxu1 %v484_v0  ;;  %417 = vmatpush3.bf16.msra.mxu0 %v450_v14 }
  0x23   :  { %418 = vmatprep.subr.bf16.mxu0 %v484_v0 }
  0x25   :  { %403 = vmatpush3.bf16.msra.mxu1 %v445_v9 }
  0x26   :  { %404 = vmatprep.subr.bf16.mxu1 %v484_v0  ;;  %419 = vmatpush3.bf16.msra.mxu0 %v451_v15 }
  0x27   :  { %420 = vmatprep.subr.bf16.mxu0 %v484_v0 }
  0x29   :  { %405 = vmatpush3.bf16.msra.mxu1 %v446_v10 }
  0x2a   :  { %406 = vmatprep.subr.bf16.mxu1 %v484_v0  ;;  %421 = vmatpush3.bf16.msra.mxu0 %v452_v16 }
  0x2b   :  { %422 = vmatprep.subr.bf16.mxu0 %v484_v0 }
  0x2d   :  { %407 = vmatpush3.bf16.msra.mxu1 %v447_v11 }
  0x2e   :  { %408 = vmatprep.subr.bf16.mxu1 %v484_v0  ;;  %423 = vmatpush3.bf16.msra.mxu0 %v453_v17 }
  0x2f   :  { %424 = vmatprep.subr.bf16.mxu0 %v484_v0 }
  0x31   :  { %409 = vmatpush3.bf16.msra.mxu1 %v448_v12 }
  0x32   :  { %425 = vmatpush3.bf16.msra.mxu0 %v454_v18 }
  0x33   :  { %426 = vmatprep.subr.bf16.mxu0 %v484_v0 }
  0x36   :  { %427 = vmatpush3.bf16.msra.mxu0 %v455_v27 }
  0x37   :  { %428 = vmatprep.subr.bf16.mxu0 %v484_v0 }
  0x3a   :  { %429 = vmatpush3.bf16.msra.mxu0 %v456_v28 }
  0xef   :  { %v104_v20 = vpop.f32.mrb[0].mxu0 }
  0xf0   :  { %v105_v21 = vadd.f32 %v343_v19, %v104_v20  ;;  %v392_v22 = vpop.f32.mrb[1].mxu0 }
  0xf1   :  { %v107_v23 = vpop.f32.mrb[2].mxu0 }
  0xf2   :  { %v110_v24 = vmax.f32 %v105_v21, 0.0  ;;  %v393_v25 = vpop.f32.mrb[3].mxu0 }
  0xf4   :  { %v111_v26 = vpack.c.bf16 %v110_v24, %v110_v24 }
  0xf6   :  { %411 = vmatmul.mubr.bf16.vlgmr.msra.gmra.mrb[0].mxu1 %v111_v26 }
 0x1c9   :  { %v217_v30 = vpop.f32.mrb[0].mxu1 }
 0x1ca   :  { %v218_v31 = vadd.f32 %v347_v29, %v217_v30  ;;  %v412_v32 = vpop.f32.mrb[1].mxu1 }
 0x1cb   :  { %v220_v33 = vpop.f32.mrb[2].mxu1 }
 0x1cc   :  { %v223_v34 = vmax.f32 %v218_v31, 0.0  ;;  %v413_v35 = vpop.f32.mrb[3].mxu1 }
 0x1ce   :  { %v224_v36 = vpack.c.bf16 %v223_v34, %v223_v34 }
 0x1d0   :  { %431 = vmatmul.mubr.bf16.vlgmr.msra.gmra.mrb[4].mxu0 %v224_v36 }
 0x2a3   :  { %v330_v38 = vpop.f32.mrb[4].mxu0 }
 0x2a4   :  { %v331_v39 = vadd.f32 %v356_v37, %v330_v38  ;;  %v432_v40 = vpop.f32.mrb[5].mxu0 }
 0x2a5   :  { %v333_v41 = vpop.f32.mrb[6].mxu0 }
 0x2a6   :  { %337 = vst.msk [vmem:[%s632_s7] sm:$0xff] %vm336_vm2, %v331_v39  ;;  %v433_v42 = vpop.f32.mrb[7].mxu0 }
 0x2a7   :  { %342 = vsyncpa [#allocation3], 1 }

</bundles_post_ra>
